<compile_context>
chip_gen: v6e
topology: v6e:2x2x1
jax: 0.10.0
libtpu: 0.0.40
codegen_flags: <defaults>
</compile_context>

<pallas_src>
import functools
import math

import jax
import jax.numpy as jnp
import numpy as np
from jax.experimental import pallas as pl
from jax.experimental.pallas import tpu as pltpu

_MIB = 1024 * 1024


def _transition_kernel(x_ref, scale_ref, shift_ref, w_ref, wmix_ref, o_ref,
                       *, th, wh, cout):
    # x_ref:       (th*4*wh, Cin) bf16 -- rows = (t, h_in_window, w_parity, w_half)
    # scale/shift: (1, Cin) f32        -- folded BN (inference)
    # w_ref:       (Cin, Cout) bf16    -- 1x1 conv weight, transposed
    # wmix_ref:    SMEM (2,) f32       -- [sigmoid(mw), 0.25*(1 - sigmoid(mw))]
    # o_ref:       (th*wh, Cout)
    x = x_ref[...].astype(jnp.float32)            # bf16 load -> f32 VPU math (v5e-safe)
    y = jnp.maximum(x * scale_ref[...] + shift_ref[...], 0.0)
    y = y.astype(jnp.bfloat16)                    # cast only at the MXU boundary

    # 1x1 conv: ONE bf16 MXU matmul for the whole tile (exactly the conv FLOPs).
    z = jnp.dot(y, w_ref[...], preferred_element_type=jnp.float32)  # (th*4*wh, Cout)

    # 2x2/2 pooling.  wh % 8 == 0 makes this reshape a pure re-indexing (every
    # wh-row group is sublane-aligned) and the 4 window members become
    # leading-dim selects: no strided slices, no relayout, pure VPU combine.
    z = z.reshape(th, 2, 2, wh, cout)
    z00 = z[:, 0, 0]
    z01 = z[:, 0, 1]
    z10 = z[:, 1, 0]
    z11 = z[:, 1, 1]
    mx = jnp.maximum(jnp.maximum(z00, z01), jnp.maximum(z10, z11))   # (th, wh, Cout)
    sm = (z00 + z01) + (z10 + z11)

    out = mx * wmix_ref[0] + sm * wmix_ref[1]     # 2 FMAs / output element
    o_ref[...] = out.reshape(th * wh, cout).astype(o_ref.dtype)


def _vmem_capacity_bytes():
    try:
        return int(pltpu.get_tpu_info().vmem_capacity_bytes)
    except Exception:
        return 64 * _MIB            # conservative fallback (v7x per-core VMEM)


def _per_step_vmem_bytes(th, wh, cin, cout, out_bytes):
    """Realistic per-grid-step footprint (review: count intermediates too)."""
    rows_in = th * 4 * wh
    rows_out = th * wh
    b = rows_in * cin * 2 * 2                # bf16 input block, double-buffered
    b += rows_out * cout * out_bytes * 2     # output block, double-buffered
    b += (2 * cin * 4 + cin * cout * 2) * 2  # scale/shift/weight
    b += rows_in * cin * (4 + 2)             # f32 BN value + bf16 MXU operand
    b += rows_in * cout * 4                  # z (f32)
    b += rows_out * cout * 4 * 5             # pooled slices / temps
    return b


def _pick_row_tile(n_pooled_rows, wh, cin, cout, out_bytes, budget_bytes):
    divisors = [d for d in range(1, n_pooled_rows + 1) if n_pooled_rows % d == 0]
    feasible = [t for t in divisors
                if _per_step_vmem_bytes(t, wh, cin, cout, out_bytes) <= budget_bytes]
    if not feasible:
        feasible = [1]
    # v7x megacore: prefer >= 8 grid steps (2 TCs + pipeline depth); otherwise an
    # even count; otherwise the biggest tile that fits (v5e/v6e: amortize the
    # ~0.35us per-step overhead with large tiles -- the budget already scales
    # with the 128 MiB VMEM of those chips).
    many = [t for t in feasible if n_pooled_rows // t >= 8]
    if many:
        return max(many)
    even = [t for t in feasible if (n_pooled_rows // t) % 2 == 0]
    if even:
        return max(even)
    return max(feasible)


def transition_forward(x_nchw, gamma, beta, running_mean, running_var,
                       conv_w, mw, eps=1e-5, row_tile=None,
                       out_dtype=jnp.bfloat16, output_layout="NCHW"):
    """Pallas implementation of _Transition.forward. x_nchw: (N, Cin, H, W)."""
    N, Cin, H, W = x_nchw.shape
    Cout = conv_w.shape[0]
    assert conv_w.shape == (Cout, Cin)
    assert mw.size == 1, "only the scalar-gate (bgates=False) mixgb path is implemented"

    # floor-mode 2x2/2 pooling: a trailing odd row/col is dropped (PyTorch semantics).
    Hh, Wh = H // 2, W // 2
    if Hh == 0 or Wh == 0:
        raise ValueError("spatial dims must be >= 2 for 2x2 stride-2 pooling")
    x_eff = x_nchw[:, :, :2 * Hh, :2 * Wh]

    # Pad the half-width to a multiple of 8 so every wh-row group in the kernel
    # is sublane-aligned; padded output columns are sliced off below.
    Whp = ((Wh + 7) // 8) * 8
    pad_w = Whp - Wh

    # --- layout glue: ONE fused transpose in bf16 (half the bytes of f32 and no
    # extra even/odd materialization).  Row order (n, hh, h_in_window, w_parity,
    # w_half), lanes = Cin -- same HBM traffic as a plain NCHW->NHWC transpose.
    xb = x_eff.astype(jnp.bfloat16)
    x6 = xb.reshape(N, Cin, Hh, 2, Wh, 2)
    xp = jnp.transpose(x6, (0, 2, 3, 5, 4, 1))            # (N, Hh, 2, 2, Wh, Cin)
    if pad_w:
        xp = jnp.pad(xp, ((0, 0),) * 4 + ((0, pad_w), (0, 0)))
    xp = xp.reshape(N * Hh * 4 * Whp, Cin)

    # Folded inference BatchNorm.
    scale = (gamma / jnp.sqrt(running_var + eps)).astype(jnp.float32)
    shift = (beta - running_mean * scale).astype(jnp.float32)
    scale = scale.reshape(1, Cin)
    shift = shift.reshape(1, Cin)

    w_bf16 = conv_w.T.astype(jnp.bfloat16)                # (Cin, Cout)

    s = jax.nn.sigmoid(mw.astype(jnp.float32).reshape(-1))[0]
    wmix = jnp.stack([s, 0.25 * (1.0 - s)])               # (2,) -> SMEM

    out_bytes = np.dtype(out_dtype).itemsize
    n_pooled_rows = N * Hh
    vmem_cap = _vmem_capacity_bytes()                      # 128 MiB v5e/v6e, 64 MiB v7x
    vmem_limit = int(min((vmem_cap * 3) // 4, 100 * _MIB))
    budget = (vmem_limit * 3) // 5                         # headroom for compiler temps
    th = row_tile if row_tile is not None else _pick_row_tile(
        n_pooled_rows, Whp, Cin, Cout, out_bytes, budget)
    if n_pooled_rows % th != 0:
        raise ValueError(f"row_tile={th} must divide N*Hh={n_pooled_rows}")

    rows_in_t = th * 4 * Whp
    rows_out_t = th * Whp
    num_tiles = n_pooled_rows // th

    flops = 2 * (N * Hh * 4 * Whp) * Cin * Cout + 10 * N * Hh * Whp * Cout
    bytes_accessed = (xp.size * 2 + N * Hh * Whp * Cout * out_bytes
                      + Cin * Cout * 2 + 4 * Cin * 4 + 8)

    out2d = pl.pallas_call(
        functools.partial(_transition_kernel, th=th, wh=Whp, cout=Cout),
        out_shape=jax.ShapeDtypeStruct((N * Hh * Whp, Cout), out_dtype),
        grid=(num_tiles,),
        in_specs=[
            pl.BlockSpec((rows_in_t, Cin), lambda t: (t, 0)),
            pl.BlockSpec((1, Cin), lambda t: (0, 0)),
            pl.BlockSpec((1, Cin), lambda t: (0, 0)),
            pl.BlockSpec((Cin, Cout), lambda t: (0, 0)),
            pl.BlockSpec(memory_space=pltpu.MemorySpace.SMEM),
        ],
        out_specs=pl.BlockSpec((rows_out_t, Cout), lambda t: (t, 0)),
        compiler_params=pltpu.CompilerParams(
            dimension_semantics=("parallel",),
            vmem_limit_bytes=vmem_limit),
        cost_estimate=pl.CostEstimate(
            flops=int(flops), transcendentals=0,
            bytes_accessed=int(bytes_accessed)),
    )(xp, scale, shift, w_bf16, wmix)

    out_nhwc = out2d.reshape(N, Hh, Whp, Cout)[:, :, :Wh, :]
    if output_layout == "NHWC":
        return out_nhwc                                    # no trailing transpose
    return jnp.transpose(out_nhwc, (0, 3, 1, 2))           # NCHW (PyTorch parity)


def transition_reference(x_nchw, gamma, beta, running_mean, running_var,
                         conv_w, mw, eps=1e-5):
    """Pure-JAX (f32) reference of the same forward pass."""
    xn = jnp.transpose(x_nchw, (0, 2, 3, 1)).astype(jnp.float32)
    scale = gamma / jnp.sqrt(running_var + eps)
    shift = beta - running_mean * scale
    y = jnp.maximum(xn * scale + shift, 0.0)
    y = jnp.einsum('nhwc,oc->nhwo', y, conv_w)
    mx = jax.lax.reduce_window(y, -jnp.inf, jax.lax.max,
                               (1, 2, 2, 1), (1, 2, 2, 1), 'VALID')
    av = jax.lax.reduce_window(y, 0.0, jax.lax.add,
                               (1, 2, 2, 1), (1, 2, 2, 1), 'VALID') * 0.25
    w = jax.nn.sigmoid(mw.reshape(-1))[0]
    out = mx * w + av * (1.0 - w)
    return jnp.transpose(out, (0, 3, 1, 2))


if __name__ == "__main__":
    N, Cin, Cout, H, W = 2, 16, 8, 16, 16

    key = jax.random.PRNGKey(0)
    ks = jax.random.split(key, 7)
    x = jax.random.normal(ks[0], (N, Cin, H, W), jnp.float32)
    gamma = jax.random.uniform(ks[1], (Cin,), jnp.float32, 0.5, 1.5)
    beta = 0.1 * jax.random.normal(ks[2], (Cin,), jnp.float32)
    running_mean = 0.1 * jax.random.normal(ks[3], (Cin,), jnp.float32)
    running_var = jax.random.uniform(ks[4], (Cin,), jnp.float32, 0.5, 1.5)
    conv_w = jax.random.normal(ks[5], (Cout, Cin), jnp.float32) / math.sqrt(Cin)
    mw = jax.random.normal(ks[6], (1,), jnp.float32)

    out = transition_forward(x, gamma, beta, running_mean, running_var, conv_w, mw)
    out = jax.block_until_ready(out)

    ref = transition_reference(x, gamma, beta, running_mean, running_var, conv_w, mw)
    np.testing.assert_allclose(np.asarray(out).astype(np.float32),
                               np.asarray(ref),
                               rtol=5e-2, atol=5e-2)   # bf16 boundary tolerance
    assert out.shape == (N, Cout, H // 2, W // 2)

    print("KERNEL_OK")
</pallas_src>

<mosaic_0001>
module attributes {stable_mosaic.version = 11 : i64} {
  func.func @_transition_kernel(%arg0: i32, %arg1: memref<64x16xbf16, #tpu.memory_space<vmem>>, %arg2: memref<1x16xf32, #tpu.memory_space<vmem>>, %arg3: memref<1x16xf32, #tpu.memory_space<vmem>>, %arg4: memref<16x8xbf16, #tpu.memory_space<vmem>>, %arg5: memref<2xf32, #tpu.memory_space<smem>>, %arg6: memref<16x8xbf16, #tpu.memory_space<vmem>>) attributes {dimension_semantics = [#tpu.dimension_semantics<parallel>], iteration_bounds = array<i64: 8>, scalar_prefetch = 0 : i64, scratch_operands = 0 : i64, tpu.core_type = #tpu.core_type<tc>, window_params = [{transform_indices = @transform_0, window_bounds = array<i64: 64, 16>}, {pipeline_mode = #tpu.pipeline_mode<synchronous>, transform_indices = @transform_1, window_bounds = array<i64: 1, 16>}, {pipeline_mode = #tpu.pipeline_mode<synchronous>, transform_indices = @transform_2, window_bounds = array<i64: 1, 16>}, {pipeline_mode = #tpu.pipeline_mode<synchronous>, transform_indices = @transform_3, window_bounds = array<i64: 16, 8>}, {transform_indices = @transform_4, window_bounds = array<i64: 2>}, {transform_indices = @transform_5, window_bounds = array<i64: 16, 8>}]} {
    %c0 = arith.constant 0 : index
    %c0_0 = arith.constant 0 : index
    %0 = vector.load %arg1[%c0, %c0_0] : memref<64x16xbf16, #tpu.memory_space<vmem>>, vector<64x16xbf16>
    %1 = arith.extf %0 : vector<64x16xbf16> to vector<64x16xf32>
    %c0_1 = arith.constant 0 : index
    %c0_2 = arith.constant 0 : index
    %2 = vector.load %arg2[%c0_1, %c0_2] : memref<1x16xf32, #tpu.memory_space<vmem>>, vector<1x16xf32>
    %3 = vector.broadcast %2 : vector<1x16xf32> to vector<64x16xf32>
    %4 = arith.mulf %1, %3 : vector<64x16xf32>
    %c0_3 = arith.constant 0 : index
    %c0_4 = arith.constant 0 : index
    %5 = vector.load %arg3[%c0_3, %c0_4] : memref<1x16xf32, #tpu.memory_space<vmem>>, vector<1x16xf32>
    %6 = vector.broadcast %5 : vector<1x16xf32> to vector<64x16xf32>
    %7 = arith.addf %4, %6 : vector<64x16xf32>
    %cst = arith.constant 0.000000e+00 : f32
    %8 = vector.broadcast %cst : f32 to vector<64x16xf32>
    %9 = arith.maximumf %7, %8 : vector<64x16xf32>
    %10 = arith.truncf %9 : vector<64x16xf32> to vector<64x16xbf16>
    %c0_5 = arith.constant 0 : index
    %c0_6 = arith.constant 0 : index
    %11 = vector.load %arg4[%c0_5, %c0_6] : memref<16x8xbf16, #tpu.memory_space<vmem>>, vector<16x8xbf16>
    %cst_7 = arith.constant dense<0.000000e+00> : vector<64x8xf32>
    %12 = tpu.matmul %10, %11, %cst_7 {dimension_numbers = #tpu.dot_dimension_numbers<[1], [0], [0], [1], [0, 0, 1, 1], [], []>} : vector<64x16xbf16>, vector<16x8xbf16>, vector<64x8xf32> -> vector<64x8xf32>
    %13 = vector.shape_cast %12 : vector<64x8xf32> to vector<2x2x2x8x8xf32>
    %14 = vector.extract_strided_slice %13 {offsets = [0, 0, 0, 0, 0], sizes = [2, 1, 1, 8, 8], strides = [1, 1, 1, 1, 1]} : vector<2x2x2x8x8xf32> to vector<2x1x1x8x8xf32>
    %15 = vector.shape_cast %14 : vector<2x1x1x8x8xf32> to vector<2x8x8xf32>
    %16 = vector.extract_strided_slice %13 {offsets = [0, 0, 1, 0, 0], sizes = [2, 1, 1, 8, 8], strides = [1, 1, 1, 1, 1]} : vector<2x2x2x8x8xf32> to vector<2x1x1x8x8xf32>
    %17 = vector.shape_cast %16 : vector<2x1x1x8x8xf32> to vector<2x8x8xf32>
    %18 = vector.extract_strided_slice %13 {offsets = [0, 1, 0, 0, 0], sizes = [2, 1, 1, 8, 8], strides = [1, 1, 1, 1, 1]} : vector<2x2x2x8x8xf32> to vector<2x1x1x8x8xf32>
    %19 = vector.shape_cast %18 : vector<2x1x1x8x8xf32> to vector<2x8x8xf32>
    %20 = vector.extract_strided_slice %13 {offsets = [0, 1, 1, 0, 0], sizes = [2, 1, 1, 8, 8], strides = [1, 1, 1, 1, 1]} : vector<2x2x2x8x8xf32> to vector<2x1x1x8x8xf32>
    %21 = vector.shape_cast %20 : vector<2x1x1x8x8xf32> to vector<2x8x8xf32>
    %22 = arith.maximumf %15, %17 : vector<2x8x8xf32>
    %23 = arith.maximumf %19, %21 : vector<2x8x8xf32>
    %24 = arith.maximumf %22, %23 : vector<2x8x8xf32>
    %25 = arith.addf %15, %17 : vector<2x8x8xf32>
    %26 = arith.addf %19, %21 : vector<2x8x8xf32>
    %27 = arith.addf %25, %26 : vector<2x8x8xf32>
    %c0_8 = arith.constant 0 : index
    %28 = memref.load %arg5[%c0_8] : memref<2xf32, #tpu.memory_space<smem>>
    %29 = vector.broadcast %28 : f32 to vector<2x8x8xf32>
    %30 = arith.mulf %24, %29 : vector<2x8x8xf32>
    %c1 = arith.constant 1 : index
    %31 = memref.load %arg5[%c1] : memref<2xf32, #tpu.memory_space<smem>>
    %32 = vector.broadcast %31 : f32 to vector<2x8x8xf32>
    %33 = arith.mulf %27, %32 : vector<2x8x8xf32>
    %34 = arith.addf %30, %33 : vector<2x8x8xf32>
    %35 = vector.shape_cast %34 : vector<2x8x8xf32> to vector<16x8xf32>
    %36 = arith.truncf %35 : vector<16x8xf32> to vector<16x8xbf16>
    %c0_9 = arith.constant 0 : index
    %c0_10 = arith.constant 0 : index
    %37 = vector.load %arg6[%c0_9, %c0_10] : memref<16x8xbf16, #tpu.memory_space<vmem>>, vector<16x8xbf16>
    tpu.vector_store %arg6[%c0_9, %c0_10], %36 {strides = array<i32>} : memref<16x8xbf16, #tpu.memory_space<vmem>>, vector<16x8xbf16>,
    return
  }
  func.func @transform_0(%arg0: i32) -> (i32, i32) {
    %c0_i32 = arith.constant 0 : i32
    %c0_i32_0 = arith.constant 0 : i32
    return %arg0, %c0_i32 : i32, i32
  }
  func.func @transform_1(%arg0: i32) -> (i32, i32) {
    %c0_i32 = arith.constant 0 : i32
    %c0_i32_0 = arith.constant 0 : i32
    %c0_i32_1 = arith.constant 0 : i32
    return %c0_i32, %c0_i32_0 : i32, i32
  }
  func.func @transform_2(%arg0: i32) -> (i32, i32) {
    %c0_i32 = arith.constant 0 : i32
    %c0_i32_0 = arith.constant 0 : i32
    %c0_i32_1 = arith.constant 0 : i32
    return %c0_i32, %c0_i32_0 : i32, i32
  }
  func.func @transform_3(%arg0: i32) -> (i32, i32) {
    %c0_i32 = arith.constant 0 : i32
    %c0_i32_0 = arith.constant 0 : i32
    %c0_i32_1 = arith.constant 0 : i32
    return %c0_i32, %c0_i32_0 : i32, i32
  }
  func.func @transform_4(%arg0: i32) -> i32 {
    %c0_i32 = arith.constant 0 : i32
    %c0_i32_0 = arith.constant 0 : i32
    return %c0_i32 : i32
  }
  func.func @transform_5(%arg0: i32) -> (i32, i32) {
    %c0_i32 = arith.constant 0 : i32
    %c0_i32_0 = arith.constant 0 : i32
    return %arg0, %c0_i32 : i32, i32
  }
}

</mosaic_0001>

<bundles_post_ra>
// kernel: tpu_custom_call.1
= control target key start
LH: loop header
LB: loop body
LE: loop exit
PB: predicated region body
PF: predicated region fallthrough
CT: control target
= control target key end

     0   :  { %10 = vsyncpa [#allocation3], 0  ;;  %s627_s18 = smov 0   ;;  %s679_s0 = inlined_call_operand.vmem [shape: bf16[512,16], index: 0, kind: input, shape index: {}]   ;;  %s680_s1 = inlined_call_operand.vmem [shape: f32[1,16], index: 1, kind: input, shape index: {}]   ;;  %s681_s2 = inlined_call_operand.vmem [shape: f32[1,16], index: 2, kind: input, shape index: {}]   ;;  %s682_s3 = inlined_call_operand.vmem [shape: bf16[16,8], index: 3, kind: input, shape index: {}]   ;;  %s683_s4 = inlined_call_operand.vmem [shape: f32[2], index: 4, kind: input, shape index: {}]   ;;  %s684_s5 = inlined_call_operand.vmem [shape: bf16[128,8], index: 5, kind: output, shape index: {}]  }
   0x1 LB: > { %s633_s19 = sadd.s32 4294967295, %s594_s18   ;;  %p490_p0 = scmp.ge.s32.totalorder %s594_s18, 1  ;;  %s594_s18 = sphi %s627_s18, %s16_s18  }
   0x2   : > { %p157_p1 = scmp.lt.s32.totalorder %s594_s18, 9  ;;  %s179_s22 = sshll.u32 %s683_s4, 4  ;;  %s180_s22 = int_to_ptr.vmem [resolvable:$true] %s179_s22 }
   0x3   : > { %p557_p3 = scmp.eq.s32.totalorder %s633_s19, 0  ;;  %s569_s24 = scalar_lea.vmem %s180_s22, 16 }
   0x4   : > { %p640_p2 = pnand %p490_p0, %p157_p1  ;;  %p570_p6 = scmp.ne.s32.totalorder %s180_s22, %s569_s24 }
   0x5   : > { %p577_p10 = scmp.lt.s32.totalorder %s180_s22, %s180_s22  ;;  %p578_p11 = scmp.lt.s32.totalorder %s569_s24, %s569_s24 }
   0x6   : > { %p553_p4 = pneg %p640_p2 }
   0x7   : > { %p579_p12 = por %p578_p11, %p577_p10 }
   0x8   : > { %p554_p5 = pnand %p557_p3, %p553_p4 }
   0xa   : > { %p571_p7 = pneg %p554_p5 }
   0xc   : > { %p572_p8 = pnand %p571_p7, %p570_p6 }
   0xe   : > { %p573_p9 = pneg %p572_p8 }
  0x10   : > { %p580_p13 = pnand %p579_p12, %p573_p9 }
  0x12   : > { %583 = shalt.err (!%p580_p13)
}
  0x13   : > { %s596_s25 = smov [#allocation2]   ;;  %201 = sbr.rel (%p640_p2) target bundleno = 255 (0xff), region = 40 }
  0x14   : > { %556 = dma.vmem_to_smem (!%p554_p5), %s180_s22, 16, %s596_s25, [#allocation3]  }
  0x18   : > { %589 = dma.done.wait (%p557_p3), [#allocation3], 16  }
  0x19   : > { %591 = vsyncadd (%p557_p3), [#allocation3], 4294967280 }
  0x1a   : > { %207 = sfence }
  0x1b   : > { %v568_v0 = vld [vmem:[%s682_s3] sm:$0xff]   ;;  %s495_s28 = sshll.u32 %s633_s19, 3  ;;  %vm309_vm0 = vcmask 130048   ;;  %s399_s12 = sld [smem:[#allocation2]]  ;;  %vm417_vm1 = vcmask 60416  }
  0x1c   : > { %p231_p0 = scmp.lt.s32.totalorder %s495_s28, 63  ;;  %537 = vmatprep.subr.bf16.mxu0 %v568_v0  ;;  %547 = vmatprep.subr.bf16.mxu1 %v568_v0  ;;  %v499_v1 = vld [vmem:[%s680_s1] ss:$0 sm:$0xff]  ;;  %s497_s13 = sshll.u32 %s633_s19, 1 }
  0x1d   : > { %538 = vmatpush3.bf16.msra.mxu0 %v568_v0  ;;  %548 = vmatpush3.bf16.msra.mxu1 %v568_v0  ;;  %v500_v10 = vld [vmem:[%s681_s2] ss:$0 sm:$0xff]  ;;  %s506_s14 = sld [smem:[#allocation2 + $0x1]]  ;;  %p237_p1 = scmp.lt.s32.totalorder %s497_s13, 15 }
  0x1e   : > { %s687_s28 = smov (!%p231_p0, %s495_s28), 63 }
  0x1f   : > { %s496_s29 = sshll.u32 %s687_s28, 2  ;;  %s689_s13 = smov (!%p237_p1, %s497_s13), 15 }
  0x20   : > { %s234_s7 = scalar_lea.vmem %s679_s0, %s496_s29  ;;  %s498_s15 = sshll.u32 %s689_s13, 2 }
  0x21   : > { %v514_v2 = vld [vmem:[%s234_s7] sm:$0xff]   ;;  %v530_v3 = vld [vmem:[%s234_s7 + $0x10] sm:$0xff]   ;;  %v529_v4 = vld [vmem:[%s234_s7 + $0x8] sm:$0xff]   ;;  %v400_v59 = vstv %s399_s12  ;;  %s240_s19 = scalar_lea.vmem %s684_s5, %s498_s15 }
  0x22   : > { %v515_v5 = vunpack.c.l.bf16 %v514_v2  ;;  %v516_v6 = vunpack.c.h.bf16 %v514_v2  ;;  %v523_v7 = vunpack.c.l.bf16 %v530_v3  ;;  %v524_v8 = vunpack.c.h.bf16 %v530_v3  ;;  %v531_v9 = vld [vmem:[%s234_s7 + $0x18] sm:$0xff]  }
  0x23   : > { %v519_v11 = vunpack.c.l.bf16 %v529_v4  ;;  %v520_v12 = vunpack.c.h.bf16 %v529_v4  ;;  %v527_v13 = vunpack.c.l.bf16 %v531_v9  ;;  %v528_v14 = vunpack.c.h.bf16 %v531_v9 }
  0x24   : > { %v266_v15 = vmul.f32 %v515_v5, %v499_v1  ;;  %v267_v16 = vmul.f32 %v516_v6, %v499_v1  ;;  %v270_v17 = vmul.f32 %v523_v7, %v499_v1  ;;  %v271_v18 = vmul.f32 %v524_v8, %v499_v1 }
  0x25   : > { %v268_v19 = vmul.f32 %v519_v11, %v499_v1  ;;  %v269_v20 = vmul.f32 %v520_v12, %v499_v1  ;;  %v272_v21 = vmul.f32 %v527_v13, %v499_v1  ;;  %v273_v22 = vmul.f32 %v528_v14, %v499_v1 }
  0x26   : > { %v281_v23 = vadd.f32 %v500_v10, %v266_v15  ;;  %v282_v24 = vadd.f32 %v500_v10, %v267_v16  ;;  %v285_v25 = vadd.f32 %v500_v10, %v270_v17  ;;  %v286_v26 = vadd.f32 %v500_v10, %v271_v18 }
  0x27   : > { %v283_v27 = vadd.f32 %v500_v10, %v268_v19  ;;  %v284_v28 = vadd.f32 %v500_v10, %v269_v20  ;;  %v287_v29 = vadd.f32 %v500_v10, %v272_v21  ;;  %v288_v30 = vadd.f32 %v500_v10, %v273_v22 }
  0x28   : > { %v289_v31 = vmax.f32 %v281_v23, 0.0  ;;  %v290_v32 = vmax.f32 %v282_v24, 0.0  ;;  %v293_v33 = vmax.f32 %v285_v25, 0.0  ;;  %v294_v34 = vmax.f32 %v286_v26, 0.0 }
  0x29   : > { %v291_v35 = vmax.f32 %v283_v27, 0.0  ;;  %v292_v36 = vmax.f32 %v284_v28, 0.0  ;;  %v295_v37 = vmax.f32 %v287_v29, 0.0  ;;  %v296_v38 = vmax.f32 %v288_v30, 0.0 }
  0x2a   : > { %v297_v39 = vpack.c.bf16 %v290_v32, %v289_v31  ;;  %v299_v40 = vpack.c.bf16 %v294_v34, %v293_v33  ;;  %v404_v60 = vstv %s506_s14 }
  0x2b   : > { %v298_v41 = vpack.c.bf16 %v292_v36, %v291_v35  ;;  %v300_v42 = vpack.c.bf16 %v296_v38, %v295_v37 }
  0x2c   : > { %539 = vmatprep.mubr.msk.bf16.mxu0 %vm309_vm0, %v297_v39  ;;  %543 = vmatprep.mubr.msk.bf16.mxu1 %vm309_vm0, %v299_v40 }
  0x2d   : > { %540 = vmatmul.mubr.msk.bf16.vlgmr.msra.gmra.mxu0 %vm309_vm0, %v298_v41  ;;  %544 = vmatmul.mubr.msk.bf16.vlgmr.msra.gmra.mxu1 %vm309_vm0, %v300_v42 }
  0xed   : > { %v541_v43 = vpop.f32.mrf.mxu0  ;;  %v545_v44 = vpop.f32.mrf.mxu1 }
  0xef   : > { %v356_v45 = vpop.f32.mrf.mxu0  ;;  %v372_v46 = vpop.f32.mrf.mxu1 }
  0xf1   : > { %v542_v47 = vpop.f32.mrf.mxu0  ;;  %v546_v48 = vpop.f32.mrf.mxu1 }
  0xf2   : > { %v389_v49 = vmax.f32 %v541_v43, %v542_v47  ;;  %v395_v50 = vadd.f32 %v542_v47, %v541_v43  ;;  %v390_v51 = vmax.f32 %v545_v44, %v546_v48  ;;  %v396_v52 = vadd.f32 %v546_v48, %v545_v44 }
  0xf3   : > { %v359_v53 = vpop.f32.mrf.mxu0  ;;  %v375_v54 = vpop.f32.mrf.mxu1 }
  0xf4   : > { %v387_v55 = vmax.f32 %v356_v45, %v359_v53  ;;  %v393_v56 = vadd.f32 %v359_v53, %v356_v45  ;;  %v388_v57 = vmax.f32 %v372_v46, %v375_v54  ;;  %v394_v58 = vadd.f32 %v375_v54, %v372_v46 }
  0xf6   : > { %v391_v61 = vmax.f32 %v387_v55, %v389_v49  ;;  %v397_v62 = vadd.f32 %v395_v50, %v393_v56  ;;  %v392_v63 = vmax.f32 %v388_v57, %v390_v51  ;;  %v398_v0 = vadd.f32 %v396_v52, %v394_v58 }
  0xf8   : > { %v401_v1 = vmul.f32 %v400_v59, %v391_v61  ;;  %v405_v2 = vmul.f32 %v404_v60, %v397_v62  ;;  %v402_v3 = vmul.f32 %v400_v59, %v392_v63  ;;  %v406_v4 = vmul.f32 %v404_v60, %v398_v0 }
  0xfa   : > { %v407_v5 = vadd.f32 %v405_v2, %v401_v1  ;;  %v408_v6 = vadd.f32 %v406_v4, %v402_v3 }
  0xfc   : > { %v511_v7 = vpack.c.bf16 %v407_v5, %v407_v5  ;;  %v512_v8 = vpack.c.bf16 %v408_v6, %v408_v6 }
  0xfe   : > { %418 = vst.msk [vmem:[%s240_s19] sm:$0xf] %vm417_vm1, %v511_v7  ;;  %419 = vst.msk [vmem:[%s240_s19 + $0x4] sm:$0xf] %vm417_vm1, %v512_v8 }
  0xff PF: > { %s16_s18 = sadd.s32 1, %s594_s18  }
 0x100   : > { %p13_p2 = scmp.ge.s32.totalorder %s16_s18, 10  }
 0x102   :  { %15 = sbr.rel (!%p13_p2) target bundleno = 1 (0x1), region = 75 }
 0x107   :  { %442 = vsyncpa [#allocation3], 1 }
 0x108   :  { %444 = vsyncpa [#allocation3 + $0x1], 1 }

</bundles_post_ra>
